<compile_context>
chip_gen: v7x
topology: tpu7x:2x2x1
jax: 0.10.0
libtpu: 0.0.40
codegen_flags: <defaults>
</compile_context>

<pallas_src>
import functools

import jax
import jax.numpy as jnp
from jax.experimental import pallas as pl
from jax.experimental.pallas import tpu as pltpu

EPS = 1e-5          # nn.BatchNorm2d default
LANE = 128


# --------------------------------------------------------------------------
# helpers
# --------------------------------------------------------------------------
def _round_up(x, m):
    return (x + m - 1) // m * m


def _pad2d(a, rows, cols):
    r, c = a.shape
    if r == rows and c == cols:
        return a
    return jnp.pad(a, ((0, rows - r), (0, cols - c)))


def _vec_pad(v, cols):
    return _pad2d(v.reshape(1, -1).astype(jnp.float32), 1, cols)


def _pick_tm(m):
    # <=512 rows per matmul tile; multiple of 16 for bf16 sublane packing.
    return min(512, _round_up(max(m, 16), 16))


def _pick_apply_tm(mp, tm):
    # The apply pass is pure streaming: use the largest tile (<=2048) that
    # still divides the padded M chosen for the matmul pass.
    for mult in (4, 2, 1):
        t = tm * mult
        if t <= 2048 and mp % t == 0:
            return t
    return tm


def _vmem_limit_bytes(stream_bytes, resident_bytes=0):
    # Room for ~triple buffering of the per-step streams plus resident blocks,
    # clamped to 48 MiB so the request leaves headroom on v7x (64 MiB VMEM).
    need = 3 * stream_bytes + resident_bytes + (4 << 20)
    return int(min(max(need, 16 << 20), 48 << 20))


# --------------------------------------------------------------------------
# Phase A: conv-as-matmul (bf16 MXU, f32 acc) + per-tile moment partials
# --------------------------------------------------------------------------
def _make_conv_stats_kernel(store_y):
    def kernel(p_ref, w_ref, *out_refs):
        y = jnp.dot(p_ref[...], w_ref[...], preferred_element_type=jnp.float32)
        if store_y:
            y_ref, part_ref = out_refs
            y_ref[...] = y.astype(y_ref.dtype)          # bf16 writeback
        else:
            (part_ref,) = out_refs
        c = y.shape[1]
        s = jnp.sum(y, axis=0, keepdims=True)           # (1, Cp) f32
        q = jnp.sum(y * y, axis=0, keepdims=True)       # (1, Cp) f32
        # rows 0/1 of this tile's (8, Cp) partial slab carry sum / sum-of-sq.
        row = jax.lax.broadcasted_iota(jnp.int32, (8, c), 0)
        part_ref[...] = jnp.where(row == 0, s, jnp.where(row == 1, q, 0.0))
    return kernel


def conv_stats_pallas(p, w, *, tm, store_y=True, y_dtype=jnp.bfloat16):
    """p: [Mp, Kp] bf16 (zero-padded), w: [Kp, Cp] bf16 (zero-padded).
    Returns (y [Mp, Cp] or None, col_sum [Cp] f32, col_sumsq [Cp] f32)."""
    Mp, Kp = p.shape
    Kp2, Cp = w.shape
    assert Kp == Kp2 and Mp % tm == 0
    grid_m = Mp // tm

    if grid_m >= 3 and tm * Kp * 2 <= (2 << 20):
        p_spec = pl.BlockSpec((tm, Kp), lambda i: (i, 0),
                              pipeline_mode=pl.Buffered(3))
    else:
        p_spec = pl.BlockSpec((tm, Kp), lambda i: (i, 0))
    w_spec = pl.BlockSpec((Kp, Cp), lambda i: (0, 0))
    part_shape = jax.ShapeDtypeStruct((grid_m * 8, Cp), jnp.float32)
    part_spec = pl.BlockSpec((8, Cp), lambda i: (i, 0))

    y_bytes = tm * Cp * jnp.dtype(y_dtype).itemsize if store_y else 0
    vmem = _vmem_limit_bytes(tm * Kp * 2 + y_bytes + 8 * Cp * 4, Kp * Cp * 2)

    if store_y:
        out_shape = (jax.ShapeDtypeStruct((Mp, Cp), y_dtype), part_shape)
        out_specs = (pl.BlockSpec((tm, Cp), lambda i: (i, 0)), part_spec)
    else:
        out_shape = part_shape
        out_specs = part_spec

    outs = pl.pallas_call(
        _make_conv_stats_kernel(store_y),
        out_shape=out_shape,
        grid=(grid_m,),
        in_specs=[p_spec, w_spec],
        out_specs=out_specs,
        compiler_params=pltpu.CompilerParams(
            dimension_semantics=("parallel",),   # per-tile partials, no carry
            vmem_limit_bytes=vmem),
    )(p, w)

    if store_y:
        y, part = outs
    else:
        y, part = None, outs
    part = part.reshape(grid_m, 8, Cp)
    return y, jnp.sum(part[:, 0, :], axis=0), jnp.sum(part[:, 1, :], axis=0)


# --------------------------------------------------------------------------
# BN folding (plain JAX, tiny vectors between the two phases)
# --------------------------------------------------------------------------
def _bn_fold(col_sum, col_sq, gamma, beta, m, cout, cp):
    mean = col_sum[:cout] / m
    # Single-pass moments in f32; clamp guards against cancellation.
    # TODO(synk): two-pass (mean then variance) for very large M / deep layers.
    var = jnp.maximum(col_sq[:cout] / m - mean * mean, 0.0)
    scale = gamma.astype(jnp.float32) * jax.lax.rsqrt(var + EPS)
    bias = beta.astype(jnp.float32) - mean * scale
    return _vec_pad(scale, cp), _vec_pad(bias, cp)


# --------------------------------------------------------------------------
# Phase B: apply folded BN (+ residual / fused 1x1-conv shortcut) (+ ReLU)
# --------------------------------------------------------------------------
def _make_apply_kernel(mode, relu):
    def kernel(*refs):
        if mode == "plain":
            y_ref, sc_ref, b_ref, o_ref = refs
            out = y_ref[...].astype(jnp.float32) * sc_ref[...] + b_ref[...]
        elif mode == "residual_raw":
            y_ref, sc_ref, b_ref, r_ref, o_ref = refs
            out = (y_ref[...].astype(jnp.float32) * sc_ref[...] + b_ref[...]
                   + r_ref[...].astype(jnp.float32))
        else:  # "residual_proj": recompute 1x1-conv shortcut on the MXU
            y_ref, sc_ref, b_ref, xs_ref, ws_ref, rsc_ref, rb_ref, o_ref = refs
            ysc = jnp.dot(xs_ref[...], ws_ref[...],
                          preferred_element_type=jnp.float32)
            out = (y_ref[...].astype(jnp.float32) * sc_ref[...] + b_ref[...]
                   + ysc * rsc_ref[...] + rb_ref[...])
        if relu:
            out = jnp.maximum(out, 0.0)
        o_ref[...] = out.astype(o_ref.dtype)
    return kernel


def bn_apply_pallas(y, scale, bias, *, tm, relu, out_dtype,
                    residual=None, proj=None):
    """y: [Mp, Cp] bf16 pre-BN activations. scale/bias: [1, Cp] f32 folded BN.
    residual: raw bf16 [Mp, Cp] added after BN (identity shortcut).
    proj: (xs [Mp,Kps] bf16, ws [Kps,Cp] bf16, rscale, rbias) fused 1x1+BN."""
    Mp, Cp = y.shape
    assert Mp % tm == 0
    grid_m = Mp // tm

    def row_spec(cols):
        return pl.BlockSpec((tm, cols), lambda i: (i, 0))

    def vec_spec():
        return pl.BlockSpec((1, Cp), lambda i: (0, 0))

    inputs = [y, scale, bias]
    in_specs = [row_spec(Cp), vec_spec(), vec_spec()]
    stream = tm * Cp * (y.dtype.itemsize + jnp.dtype(out_dtype).itemsize)
    resident = 4 * Cp * 4

    if proj is not None:
        mode = "residual_proj"
        xs, ws, rscale, rbias = proj
        Kps = xs.shape[1]
        inputs += [xs, ws, rscale, rbias]
        in_specs += [row_spec(Kps),
                     pl.BlockSpec((Kps, Cp), lambda i: (0, 0)),
                     vec_spec(), vec_spec()]
        stream += tm * Kps * xs.dtype.itemsize
        resident += Kps * Cp * ws.dtype.itemsize + 2 * Cp * 4
    elif residual is not None:
        mode = "residual_raw"
        inputs.append(residual)
        in_specs.append(row_spec(Cp))
        stream += tm * Cp * residual.dtype.itemsize
    else:
        mode = "plain"

    return pl.pallas_call(
        _make_apply_kernel(mode, relu),
        out_shape=jax.ShapeDtypeStruct((Mp, Cp), out_dtype),
        grid=(grid_m,),
        in_specs=in_specs,
        out_specs=pl.BlockSpec((tm, Cp), lambda i: (i, 0)),
        compiler_params=pltpu.CompilerParams(
            dimension_semantics=("parallel",),
            vmem_limit_bytes=_vmem_limit_bytes(stream, resident)),
    )(*inputs)


# --------------------------------------------------------------------------
# Glue: im2col patch extraction + weight reshaping (plain JAX, bf16 streams)
# --------------------------------------------------------------------------
def im2col_3x3(x_nhwc, stride):
    N, H, W, C = x_nhwc.shape
    Ho = (H - 1) // stride + 1
    Wo = (W - 1) // stride + 1
    xp = jnp.pad(x_nhwc, ((0, 0), (1, 1), (1, 1), (0, 0)))
    cols = []
    for kh in range(3):
        for kw in range(3):
            cols.append(xp[:, kh:kh + (Ho - 1) * stride + 1:stride,
                           kw:kw + (Wo - 1) * stride + 1:stride, :])
    pat = jnp.stack(cols, axis=3)                      # [N, Ho, Wo, 9, C]
    return pat.reshape(N * Ho * Wo, 9 * C), (N, Ho, Wo)


def w3x3_to_2d(w):   # PyTorch [Cout, Cin, 3, 3] -> [9*Cin, Cout]  (kh, kw, cin)
    Cout, Cin, _, _ = w.shape
    return jnp.transpose(w, (2, 3, 1, 0)).reshape(9 * Cin, Cout)


def w1x1_to_2d(w):   # PyTorch [Cout, Cin, 1, 1] -> [Cin, Cout]
    return jnp.transpose(w[:, :, 0, 0], (1, 0))


# --------------------------------------------------------------------------
# BasicBlock forward
# --------------------------------------------------------------------------
def basic_block_forward(x_nchw, params, stride):
    x = jnp.transpose(x_nchw, (0, 2, 3, 1)).astype(jnp.bfloat16)    # NHWC bf16
    N, H, W, Cin = x.shape
    planes = params["w1"].shape[0]
    Cp = _round_up(planes, LANE)

    # ---- conv1 (3x3, stride) + bn1 + relu ----
    p1, (n, ho, wo) = im2col_3x3(x, stride)
    M = n * ho * wo
    tm = _pick_tm(M)
    Mp = _round_up(M, tm)
    tma = _pick_apply_tm(Mp, tm)
    Kp1 = _round_up(p1.shape[1], LANE)

    y1, s1, q1 = conv_stats_pallas(
        _pad2d(p1, Mp, Kp1),
        _pad2d(w3x3_to_2d(params["w1"]).astype(jnp.bfloat16), Kp1, Cp), tm=tm)
    sc1, b1 = _bn_fold(s1, q1, params["g1"], params["b1"], M, planes, Cp)
    out1 = bn_apply_pallas(y1, sc1, b1, tm=tma, relu=True,
                           out_dtype=jnp.bfloat16)
    out1 = out1[:M, :planes].reshape(n, ho, wo, planes)              # bf16

    # ---- conv2 (3x3, stride 1) stats ----
    p2, _ = im2col_3x3(out1, 1)
    Kp2 = _round_up(p2.shape[1], LANE)
    y2, s2, q2 = conv_stats_pallas(
        _pad2d(p2, Mp, Kp2),
        _pad2d(w3x3_to_2d(params["w2"]).astype(jnp.bfloat16), Kp2, Cp), tm=tm)
    sc2, b2 = _bn_fold(s2, q2, params["g2"], params["b2"], M, planes, Cp)

    # ---- shortcut + fused bn2 / residual / ReLU epilogue ----
    if "ws" in params:
        # projection shortcut: 1x1 strided conv + BN, fused into the apply pass
        Kps = _round_up(Cin, LANE)
        xs = _pad2d(x[:, ::stride, ::stride, :].reshape(M, Cin), Mp, Kps)
        ws = _pad2d(w1x1_to_2d(params["ws"]).astype(jnp.bfloat16), Kps, Cp)
        _, ss, qs = conv_stats_pallas(xs, ws, tm=tma, store_y=False)
        scs, bs = _bn_fold(ss, qs, params["gs"], params["bs"], M, planes, Cp)
        out = bn_apply_pallas(y2, sc2, b2, tm=tma, relu=True,
                              out_dtype=jnp.float32, proj=(xs, ws, scs, bs))
    else:
        # identity shortcut (stride==1 and Cin==planes by construction)
        residual = _pad2d(x.reshape(M, Cin), Mp, Cp)                  # bf16
        out = bn_apply_pallas(y2, sc2, b2, tm=tma, relu=True,
                              out_dtype=jnp.float32, residual=residual)

    out = out[:M, :planes].reshape(n, ho, wo, planes)
    return jnp.transpose(out, (0, 3, 1, 2))                           # NCHW


# --------------------------------------------------------------------------
# Pure-JAX reference for verification (bf16 conv operands to mirror the MXU)
# --------------------------------------------------------------------------
def _ref_conv(x_nhwc, w_pt, stride, pad):
    wh = jnp.transpose(w_pt, (2, 3, 1, 0)).astype(jnp.bfloat16)       # HWIO
    return jax.lax.conv_general_dilated(
        x_nhwc.astype(jnp.bfloat16), wh, (stride, stride),
        [(pad, pad), (pad, pad)],
        dimension_numbers=("NHWC", "HWIO", "NHWC"),
        preferred_element_type=jnp.float32)


def _ref_bn(y, g, b):
    m = jnp.mean(y, axis=(0, 1, 2), keepdims=True)
    v = jnp.mean((y - m) ** 2, axis=(0, 1, 2), keepdims=True)
    return (y - m) * jax.lax.rsqrt(v + EPS) * g + b


def ref_forward(x_nchw, params, stride):
    x = jnp.transpose(x_nchw, (0, 2, 3, 1)).astype(jnp.float32)
    out = jax.nn.relu(_ref_bn(_ref_conv(x, params["w1"], stride, 1),
                              params["g1"], params["b1"]))
    out = _ref_bn(_ref_conv(out, params["w2"], 1, 1), params["g2"], params["b2"])
    if "ws" in params:
        sc = _ref_bn(_ref_conv(x, params["ws"], stride, 0),
                     params["gs"], params["bs"])
    else:
        sc = x
    return jnp.transpose(jax.nn.relu(out + sc), (0, 3, 1, 2))


# --------------------------------------------------------------------------
def init_params(key, in_planes, planes, stride):
    ks = jax.random.split(key, 3)
    params = {
        "w1": 0.1 * jax.random.normal(ks[0], (planes, in_planes, 3, 3), jnp.float32),
        "g1": jnp.ones((planes,), jnp.float32),
        "b1": jnp.zeros((planes,), jnp.float32),
        "w2": 0.1 * jax.random.normal(ks[1], (planes, planes, 3, 3), jnp.float32),
        "g2": jnp.ones((planes,), jnp.float32),
        "b2": jnp.zeros((planes,), jnp.float32),
    }
    if stride != 1 or in_planes != planes:
        params["ws"] = 0.1 * jax.random.normal(ks[2], (planes, in_planes, 1, 1),
                                               jnp.float32)
        params["gs"] = jnp.ones((planes,), jnp.float32)
        params["bs"] = jnp.zeros((planes,), jnp.float32)
    return params


if __name__ == "__main__":
    key = jax.random.PRNGKey(0)

    configs = [
        # (N, in_planes, H, W, planes, stride)
        (2, 4, 16, 16, 8, 2),    # projection shortcut (fused 1x1 conv + BN)
        (2, 8, 16, 16, 8, 1),    # identity shortcut (raw bf16 residual)
    ]
    for idx, (N, in_planes, H, W, planes, stride) in enumerate(configs):
        kx, kp, key = jax.random.split(key, 3)
        x = jax.random.normal(kx, (N, in_planes, H, W), jnp.float32)
        params = init_params(kp, in_planes, planes, stride)

        fwd = jax.jit(functools.partial(basic_block_forward, stride=stride))
        out = fwd(x, params)
        jax.block_until_ready(out)

        ref = ref_forward(x, params, stride)
        assert out.shape == ref.shape == (N, planes, H // stride, W // stride)
        # Kernel stores intermediates (pre-BN activations, residual) in bf16,
        # so allow a little more slack than pure bf16-matmul rounding.
        err = float(jnp.max(jnp.abs(out - ref)))
        assert jnp.allclose(out, ref, atol=3e-2, rtol=3e-2), (
            f"mismatch vs reference (config {idx}): max abs err {err}")

    print("KERNEL_OK")
</pallas_src>

<mosaic_0001>
module attributes {stable_mosaic.version = 11 : i64} {
  func.func @kernel(%arg0: i32, %arg1: memref<128x128xbf16, #tpu.memory_space<vmem>>, %arg2: memref<128x128xbf16, #tpu.memory_space<vmem>>, %arg3: memref<128x128xbf16, #tpu.memory_space<vmem>>, %arg4: memref<8x128xf32, #tpu.memory_space<vmem>>) attributes {dimension_semantics = [#tpu.dimension_semantics<parallel>], iteration_bounds = array<i64: 1>, scalar_prefetch = 0 : i64, scratch_operands = 0 : i64, tpu.core_type = #tpu.core_type<tc>, window_params = [{transform_indices = @transform_0, window_bounds = array<i64: 128, 128>}, {pipeline_mode = #tpu.pipeline_mode<synchronous>, transform_indices = @transform_1, window_bounds = array<i64: 128, 128>}, {transform_indices = @transform_2, window_bounds = array<i64: 128, 128>}, {transform_indices = @transform_3, window_bounds = array<i64: 8, 128>}]} {
    %c0 = arith.constant 0 : index
    %c0_0 = arith.constant 0 : index
    %0 = vector.load %arg1[%c0, %c0_0] : memref<128x128xbf16, #tpu.memory_space<vmem>>, vector<128x128xbf16>
    %c0_1 = arith.constant 0 : index
    %c0_2 = arith.constant 0 : index
    %1 = vector.load %arg2[%c0_1, %c0_2] : memref<128x128xbf16, #tpu.memory_space<vmem>>, vector<128x128xbf16>
    %cst = arith.constant dense<0.000000e+00> : vector<128x128xf32>
    %2 = tpu.matmul %0, %1, %cst {dimension_numbers = #tpu.dot_dimension_numbers<[1], [0], [0], [1], [0, 0, 1, 1], [], []>} : vector<128x128xbf16>, vector<128x128xbf16>, vector<128x128xf32> -> vector<128x128xf32>
    %3 = arith.truncf %2 : vector<128x128xf32> to vector<128x128xbf16>
    %c0_3 = arith.constant 0 : index
    %c0_4 = arith.constant 0 : index
    %4 = vector.load %arg3[%c0_3, %c0_4] : memref<128x128xbf16, #tpu.memory_space<vmem>>, vector<128x128xbf16>
    tpu.vector_store %arg3[%c0_3, %c0_4], %3 {strides = array<i32>} : memref<128x128xbf16, #tpu.memory_space<vmem>>, vector<128x128xbf16>,
    %cst_5 = arith.constant dense<0.000000e+00> : vector<128xf32>
    %5 = vector.multi_reduction <add>, %2, %cst_5 [0] : vector<128x128xf32> to vector<128xf32>
    %6 = vector.shape_cast %5 : vector<128xf32> to vector<1x128xf32>
    %7 = arith.mulf %2, %2 : vector<128x128xf32>
    %cst_6 = arith.constant dense<0.000000e+00> : vector<128xf32>
    %8 = vector.multi_reduction <add>, %7, %cst_6 [0] : vector<128x128xf32> to vector<128xf32>
    %9 = vector.shape_cast %8 : vector<128xf32> to vector<1x128xf32>
    %10 = tpu.iota {dimensions = array<i32: 0>} : vector<8x128xi32>
    %c0_i32 = arith.constant 0 : i32
    %11 = vector.broadcast %c0_i32 : i32 to vector<8x128xi32>
    %12 = arith.cmpi eq, %10, %11 : vector<8x128xi32>
    %c1_i32 = arith.constant 1 : i32
    %13 = vector.broadcast %c1_i32 : i32 to vector<8x128xi32>
    %14 = arith.cmpi eq, %10, %13 : vector<8x128xi32>
    %cst_7 = arith.constant 0.000000e+00 : f32
    %15 = vector.shape_cast %9 : vector<1x128xf32> to vector<1x128xf32>
    %16 = vector.broadcast %15 : vector<1x128xf32> to vector<8x128xf32>
    %17 = vector.broadcast %cst_7 : f32 to vector<8x128xf32>
    %18 = arith.select %14, %16, %17 : vector<8x128xi1>, vector<8x128xf32>
    %19 = vector.shape_cast %6 : vector<1x128xf32> to vector<1x128xf32>
    %20 = vector.broadcast %19 : vector<1x128xf32> to vector<8x128xf32>
    %21 = arith.select %12, %20, %18 : vector<8x128xi1>, vector<8x128xf32>
    %c0_8 = arith.constant 0 : index
    %c0_9 = arith.constant 0 : index
    %22 = vector.load %arg4[%c0_8, %c0_9] : memref<8x128xf32, #tpu.memory_space<vmem>>, vector<8x128xf32>
    tpu.vector_store %arg4[%c0_8, %c0_9], %21 {strides = array<i32>} : memref<8x128xf32, #tpu.memory_space<vmem>>, vector<8x128xf32>,
    return
  }
  func.func @transform_0(%arg0: i32) -> (i32, i32) {
    %c0_i32 = arith.constant 0 : i32
    %c0_i32_0 = arith.constant 0 : i32
    return %arg0, %c0_i32 : i32, i32
  }
  func.func @transform_1(%arg0: i32) -> (i32, i32) {
    %c0_i32 = arith.constant 0 : i32
    %c0_i32_0 = arith.constant 0 : i32
    %c0_i32_1 = arith.constant 0 : i32
    return %c0_i32, %c0_i32_0 : i32, i32
  }
  func.func @transform_2(%arg0: i32) -> (i32, i32) {
    %c0_i32 = arith.constant 0 : i32
    %c0_i32_0 = arith.constant 0 : i32
    return %arg0, %c0_i32 : i32, i32
  }
  func.func @transform_3(%arg0: i32) -> (i32, i32) {
    %c0_i32 = arith.constant 0 : i32
    %c0_i32_0 = arith.constant 0 : i32
    return %arg0, %c0_i32 : i32, i32
  }
}

module attributes {stable_mosaic.version = 11 : i64} {
  func.func @kernel(%arg0: i32, %arg1: memref<128x128xbf16, #tpu.memory_space<vmem>>, %arg2: memref<1x128xf32, #tpu.memory_space<vmem>>, %arg3: memref<1x128xf32, #tpu.memory_space<vmem>>, %arg4: memref<128x128xbf16, #tpu.memory_space<vmem>>) attributes {dimension_semantics = [#tpu.dimension_semantics<parallel>], iteration_bounds = array<i64: 1>, scalar_prefetch = 0 : i64, scratch_operands = 0 : i64, tpu.core_type = #tpu.core_type<tc>, window_params = [{transform_indices = @transform_0, window_bounds = array<i64: 128, 128>}, {pipeline_mode = #tpu.pipeline_mode<synchronous>, transform_indices = @transform_1, window_bounds = array<i64: 1, 128>}, {pipeline_mode = #tpu.pipeline_mode<synchronous>, transform_indices = @transform_2, window_bounds = array<i64: 1, 128>}, {transform_indices = @transform_3, window_bounds = array<i64: 128, 128>}]} {
    %c0 = arith.constant 0 : index
    %c0_0 = arith.constant 0 : index
    %0 = vector.load %arg1[%c0, %c0_0] : memref<128x128xbf16, #tpu.memory_space<vmem>>, vector<128x128xbf16>
    %1 = arith.extf %0 : vector<128x128xbf16> to vector<128x128xf32>
    %c0_1 = arith.constant 0 : index
    %c0_2 = arith.constant 0 : index
    %2 = vector.load %arg2[%c0_1, %c0_2] : memref<1x128xf32, #tpu.memory_space<vmem>>, vector<1x128xf32>
    %3 = vector.broadcast %2 : vector<1x128xf32> to vector<128x128xf32>
    %4 = arith.mulf %1, %3 : vector<128x128xf32>
    %c0_3 = arith.constant 0 : index
    %c0_4 = arith.constant 0 : index
    %5 = vector.load %arg3[%c0_3, %c0_4] : memref<1x128xf32, #tpu.memory_space<vmem>>, vector<1x128xf32>
    %6 = vector.broadcast %5 : vector<1x128xf32> to vector<128x128xf32>
    %7 = arith.addf %4, %6 : vector<128x128xf32>
    %cst = arith.constant 0.000000e+00 : f32
    %8 = vector.broadcast %cst : f32 to vector<128x128xf32>
    %9 = arith.maximumf %7, %8 : vector<128x128xf32>
    %10 = arith.truncf %9 : vector<128x128xf32> to vector<128x128xbf16>
    %c0_5 = arith.constant 0 : index
    %c0_6 = arith.constant 0 : index
    %11 = vector.load %arg4[%c0_5, %c0_6] : memref<128x128xbf16, #tpu.memory_space<vmem>>, vector<128x128xbf16>
    tpu.vector_store %arg4[%c0_5, %c0_6], %10 {strides = array<i32>} : memref<128x128xbf16, #tpu.memory_space<vmem>>, vector<128x128xbf16>,
    return
  }
  func.func @transform_0(%arg0: i32) -> (i32, i32) {
    %c0_i32 = arith.constant 0 : i32
    %c0_i32_0 = arith.constant 0 : i32
    return %arg0, %c0_i32 : i32, i32
  }
  func.func @transform_1(%arg0: i32) -> (i32, i32) {
    %c0_i32 = arith.constant 0 : i32
    %c0_i32_0 = arith.constant 0 : i32
    %c0_i32_1 = arith.constant 0 : i32
    return %c0_i32, %c0_i32_0 : i32, i32
  }
  func.func @transform_2(%arg0: i32) -> (i32, i32) {
    %c0_i32 = arith.constant 0 : i32
    %c0_i32_0 = arith.constant 0 : i32
    %c0_i32_1 = arith.constant 0 : i32
    return %c0_i32, %c0_i32_0 : i32, i32
  }
  func.func @transform_3(%arg0: i32) -> (i32, i32) {
    %c0_i32 = arith.constant 0 : i32
    %c0_i32_0 = arith.constant 0 : i32
    return %arg0, %c0_i32 : i32, i32
  }
}

module attributes {stable_mosaic.version = 11 : i64} {
  func.func @kernel(%arg0: i32, %arg1: memref<128x128xbf16, #tpu.memory_space<vmem>>, %arg2: memref<1x128xf32, #tpu.memory_space<vmem>>, %arg3: memref<1x128xf32, #tpu.memory_space<vmem>>, %arg4: memref<128x128xbf16, #tpu.memory_space<vmem>>, %arg5: memref<128x128xbf16, #tpu.memory_space<vmem>>, %arg6: memref<1x128xf32, #tpu.memory_space<vmem>>, %arg7: memref<1x128xf32, #tpu.memory_space<vmem>>, %arg8: memref<128x128xf32, #tpu.memory_space<vmem>>) attributes {dimension_semantics = [#tpu.dimension_semantics<parallel>], iteration_bounds = array<i64: 1>, scalar_prefetch = 0 : i64, scratch_operands = 0 : i64, tpu.core_type = #tpu.core_type<tc>, window_params = [{transform_indices = @transform_0, window_bounds = array<i64: 128, 128>}, {pipeline_mode = #tpu.pipeline_mode<synchronous>, transform_indices = @transform_1, window_bounds = array<i64: 1, 128>}, {pipeline_mode = #tpu.pipeline_mode<synchronous>, transform_indices = @transform_2, window_bounds = array<i64: 1, 128>}, {transform_indices = @transform_3, window_bounds = array<i64: 128, 128>}, {pipeline_mode = #tpu.pipeline_mode<synchronous>, transform_indices = @transform_4, window_bounds = array<i64: 128, 128>}, {pipeline_mode = #tpu.pipeline_mode<synchronous>, transform_indices = @transform_5, window_bounds = array<i64: 1, 128>}, {pipeline_mode = #tpu.pipeline_mode<synchronous>, transform_indices = @transform_6, window_bounds = array<i64: 1, 128>}, {transform_indices = @transform_7, window_bounds = array<i64: 128, 128>}]} {
    %c0 = arith.constant 0 : index
    %c0_0 = arith.constant 0 : index
    %0 = vector.load %arg4[%c0, %c0_0] : memref<128x128xbf16, #tpu.memory_space<vmem>>, vector<128x128xbf16>
    %c0_1 = arith.constant 0 : index
    %c0_2 = arith.constant 0 : index
    %1 = vector.load %arg5[%c0_1, %c0_2] : memref<128x128xbf16, #tpu.memory_space<vmem>>, vector<128x128xbf16>
    %cst = arith.constant dense<0.000000e+00> : vector<128x128xf32>
    %2 = tpu.matmul %0, %1, %cst {dimension_numbers = #tpu.dot_dimension_numbers<[1], [0], [0], [1], [0, 0, 1, 1], [], []>} : vector<128x128xbf16>, vector<128x128xbf16>, vector<128x128xf32> -> vector<128x128xf32>
    %c0_3 = arith.constant 0 : index
    %c0_4 = arith.constant 0 : index
    %3 = vector.load %arg1[%c0_3, %c0_4] : memref<128x128xbf16, #tpu.memory_space<vmem>>, vector<128x128xbf16>
    %4 = arith.extf %3 : vector<128x128xbf16> to vector<128x128xf32>
    %c0_5 = arith.constant 0 : index
    %c0_6 = arith.constant 0 : index
    %5 = vector.load %arg2[%c0_5, %c0_6] : memref<1x128xf32, #tpu.memory_space<vmem>>, vector<1x128xf32>
    %6 = vector.broadcast %5 : vector<1x128xf32> to vector<128x128xf32>
    %7 = arith.mulf %4, %6 : vector<128x128xf32>
    %c0_7 = arith.constant 0 : index
    %c0_8 = arith.constant 0 : index
    %8 = vector.load %arg3[%c0_7, %c0_8] : memref<1x128xf32, #tpu.memory_space<vmem>>, vector<1x128xf32>
    %9 = vector.broadcast %8 : vector<1x128xf32> to vector<128x128xf32>
    %10 = arith.addf %7, %9 : vector<128x128xf32>
    %c0_9 = arith.constant 0 : index
    %c0_10 = arith.constant 0 : index
    %11 = vector.load %arg6[%c0_9, %c0_10] : memref<1x128xf32, #tpu.memory_space<vmem>>, vector<1x128xf32>
    %12 = vector.broadcast %11 : vector<1x128xf32> to vector<128x128xf32>
    %13 = arith.mulf %2, %12 : vector<128x128xf32>
    %14 = arith.addf %10, %13 : vector<128x128xf32>
    %c0_11 = arith.constant 0 : index
    %c0_12 = arith.constant 0 : index
    %15 = vector.load %arg7[%c0_11, %c0_12] : memref<1x128xf32, #tpu.memory_space<vmem>>, vector<1x128xf32>
    %16 = vector.broadcast %15 : vector<1x128xf32> to vector<128x128xf32>
    %17 = arith.addf %14, %16 : vector<128x128xf32>
    %cst_13 = arith.constant 0.000000e+00 : f32
    %18 = vector.broadcast %cst_13 : f32 to vector<128x128xf32>
    %19 = arith.maximumf %17, %18 : vector<128x128xf32>
    %c0_14 = arith.constant 0 : index
    %c0_15 = arith.constant 0 : index
    %20 = vector.load %arg8[%c0_14, %c0_15] : memref<128x128xf32, #tpu.memory_space<vmem>>, vector<128x128xf32>
    tpu.vector_store %arg8[%c0_14, %c0_15], %19 {strides = array<i32>} : memref<128x128xf32, #tpu.memory_space<vmem>>, vector<128x128xf32>,
    return
  }
  func.func @transform_0(%arg0: i32) -> (i32, i32) {
    %c0_i32 = arith.constant 0 : i32
    %c0_i32_0 = arith.constant 0 : i32
    return %arg0, %c0_i32 : i32, i32
  }
  func.func @transform_1(%arg0: i32) -> (i32, i32) {
    %c0_i32 = arith.constant 0 : i32
    %c0_i32_0 = arith.constant 0 : i32
    %c0_i32_1 = arith.constant 0 : i32
    return %c0_i32, %c0_i32_0 : i32, i32
  }
  func.func @transform_2(%arg0: i32) -> (i32, i32) {
    %c0_i32 = arith.constant 0 : i32
    %c0_i32_0 = arith.constant 0 : i32
    %c0_i32_1 = arith.constant 0 : i32
    return %c0_i32, %c0_i32_0 : i32, i32
  }
  func.func @transform_3(%arg0: i32) -> (i32, i32) {
    %c0_i32 = arith.constant 0 : i32
    %c0_i32_0 = arith.constant 0 : i32
    return %arg0, %c0_i32 : i32, i32
  }
  func.func @transform_4(%arg0: i32) -> (i32, i32) {
    %c0_i32 = arith.constant 0 : i32
    %c0_i32_0 = arith.constant 0 : i32
    %c0_i32_1 = arith.constant 0 : i32
    return %c0_i32, %c0_i32_0 : i32, i32
  }
  func.func @transform_5(%arg0: i32) -> (i32, i32) {
    %c0_i32 = arith.constant 0 : i32
    %c0_i32_0 = arith.constant 0 : i32
    %c0_i32_1 = arith.constant 0 : i32
    return %c0_i32, %c0_i32_0 : i32, i32
  }
  func.func @transform_6(%arg0: i32) -> (i32, i32) {
    %c0_i32 = arith.constant 0 : i32
    %c0_i32_0 = arith.constant 0 : i32
    %c0_i32_1 = arith.constant 0 : i32
    return %c0_i32, %c0_i32_0 : i32, i32
  }
  func.func @transform_7(%arg0: i32) -> (i32, i32) {
    %c0_i32 = arith.constant 0 : i32
    %c0_i32_0 = arith.constant 0 : i32
    return %arg0, %c0_i32 : i32, i32
  }
}

module attributes {stable_mosaic.version = 11 : i64} {
  func.func @kernel(%arg0: i32, %arg1: memref<128x128xbf16, #tpu.memory_space<vmem>>, %arg2: memref<128x128xbf16, #tpu.memory_space<vmem>>, %arg3: memref<8x128xf32, #tpu.memory_space<vmem>>) attributes {dimension_semantics = [#tpu.dimension_semantics<parallel>], iteration_bounds = array<i64: 1>, scalar_prefetch = 0 : i64, scratch_operands = 0 : i64, tpu.core_type = #tpu.core_type<tc>, window_params = [{transform_indices = @transform_0, window_bounds = array<i64: 128, 128>}, {pipeline_mode = #tpu.pipeline_mode<synchronous>, transform_indices = @transform_1, window_bounds = array<i64: 128, 128>}, {transform_indices = @transform_2, window_bounds = array<i64: 8, 128>}]} {
    %c0 = arith.constant 0 : index
    %c0_0 = arith.constant 0 : index
    %0 = vector.load %arg1[%c0, %c0_0] : memref<128x128xbf16, #tpu.memory_space<vmem>>, vector<128x128xbf16>
    %c0_1 = arith.constant 0 : index
    %c0_2 = arith.constant 0 : index
    %1 = vector.load %arg2[%c0_1, %c0_2] : memref<128x128xbf16, #tpu.memory_space<vmem>>, vector<128x128xbf16>
    %cst = arith.constant dense<0.000000e+00> : vector<128x128xf32>
    %2 = tpu.matmul %0, %1, %cst {dimension_numbers = #tpu.dot_dimension_numbers<[1], [0], [0], [1], [0, 0, 1, 1], [], []>} : vector<128x128xbf16>, vector<128x128xbf16>, vector<128x128xf32> -> vector<128x128xf32>
    %cst_3 = arith.constant dense<0.000000e+00> : vector<128xf32>
    %3 = vector.multi_reduction <add>, %2, %cst_3 [0] : vector<128x128xf32> to vector<128xf32>
    %4 = vector.shape_cast %3 : vector<128xf32> to vector<1x128xf32>
    %5 = arith.mulf %2, %2 : vector<128x128xf32>
    %cst_4 = arith.constant dense<0.000000e+00> : vector<128xf32>
    %6 = vector.multi_reduction <add>, %5, %cst_4 [0] : vector<128x128xf32> to vector<128xf32>
    %7 = vector.shape_cast %6 : vector<128xf32> to vector<1x128xf32>
    %8 = tpu.iota {dimensions = array<i32: 0>} : vector<8x128xi32>
    %c0_i32 = arith.constant 0 : i32
    %9 = vector.broadcast %c0_i32 : i32 to vector<8x128xi32>
    %10 = arith.cmpi eq, %8, %9 : vector<8x128xi32>
    %c1_i32 = arith.constant 1 : i32
    %11 = vector.broadcast %c1_i32 : i32 to vector<8x128xi32>
    %12 = arith.cmpi eq, %8, %11 : vector<8x128xi32>
    %cst_5 = arith.constant 0.000000e+00 : f32
    %13 = vector.shape_cast %7 : vector<1x128xf32> to vector<1x128xf32>
    %14 = vector.broadcast %13 : vector<1x128xf32> to vector<8x128xf32>
    %15 = vector.broadcast %cst_5 : f32 to vector<8x128xf32>
    %16 = arith.select %12, %14, %15 : vector<8x128xi1>, vector<8x128xf32>
    %17 = vector.shape_cast %4 : vector<1x128xf32> to vector<1x128xf32>
    %18 = vector.broadcast %17 : vector<1x128xf32> to vector<8x128xf32>
    %19 = arith.select %10, %18, %16 : vector<8x128xi1>, vector<8x128xf32>
    %c0_6 = arith.constant 0 : index
    %c0_7 = arith.constant 0 : index
    %20 = vector.load %arg3[%c0_6, %c0_7] : memref<8x128xf32, #tpu.memory_space<vmem>>, vector<8x128xf32>
    tpu.vector_store %arg3[%c0_6, %c0_7], %19 {strides = array<i32>} : memref<8x128xf32, #tpu.memory_space<vmem>>, vector<8x128xf32>,
    return
  }
  func.func @transform_0(%arg0: i32) -> (i32, i32) {
    %c0_i32 = arith.constant 0 : i32
    %c0_i32_0 = arith.constant 0 : i32
    return %arg0, %c0_i32 : i32, i32
  }
  func.func @transform_1(%arg0: i32) -> (i32, i32) {
    %c0_i32 = arith.constant 0 : i32
    %c0_i32_0 = arith.constant 0 : i32
    %c0_i32_1 = arith.constant 0 : i32
    return %c0_i32, %c0_i32_0 : i32, i32
  }
  func.func @transform_2(%arg0: i32) -> (i32, i32) {
    %c0_i32 = arith.constant 0 : i32
    %c0_i32_0 = arith.constant 0 : i32
    return %arg0, %c0_i32 : i32, i32
  }
}

</mosaic_0001>

<bundles_post_ra>
// kernel: basic_block_forward.6
= control target key start
LH: loop header
LB: loop body
LE: loop exit
PB: predicated region body
PF: predicated region fallthrough
CT: control target
= control target key end

     0   :  { %s422_s0 = inlined_call_operand.vmem [shape: bf16[128,128], index: 0, kind: input, shape index: {}]   ;;  %s423_s1 = inlined_call_operand.vmem [shape: f32[1,128], index: 1, kind: input, shape index: {}]   ;;  %s424_s2 = inlined_call_operand.vmem [shape: f32[1,128], index: 2, kind: input, shape index: {}]   ;;  %s425_s3 = inlined_call_operand.vmem [shape: bf16[128,128], index: 3, kind: output, shape index: {}]  }
   0x1   :  { %v227_v0 = vld [vmem:[%s422_s0] sm:$0xff]   ;;  %v298_v4 = vld [vmem:[%s422_s0 + $0x8] sm:$0xff]   ;;  %v299_v5 = vld [vmem:[%s422_s0 + $0x10] sm:$0xff]  }
   0x2   :  { %v338_v1 = vld [vmem:[%s423_s1] ss:$0 sm:$0xff]  ;;  %v228_v2 = vunpack.c.l.bf16 %v227_v0  ;;  %v229_v3 = vunpack.c.h.bf16 %v227_v0  ;;  %v300_v6 = vld [vmem:[%s422_s0 + $0x18] sm:$0xff]   ;;  %v232_v8 = vunpack.c.l.bf16 %v298_v4  ;;  %v233_v9 = vunpack.c.h.bf16 %v298_v4  ;;  %v302_v33 = vld [vmem:[%s422_s0 + $0x28] sm:$0xff]  }
   0x3   :  { %v352_v7 = vld [vmem:[%s424_s2] ss:$0 sm:$0xff]  ;;  %v236_v10 = vunpack.c.l.bf16 %v299_v5  ;;  %v237_v11 = vunpack.c.h.bf16 %v299_v5  ;;  %v240_v14 = vunpack.c.l.bf16 %v300_v6  ;;  %v241_v15 = vunpack.c.h.bf16 %v300_v6  ;;  %v303_v38 = vld [vmem:[%s422_s0 + $0x30] sm:$0xff]   ;;  %v304_v43 = vld [vmem:[%s422_s0 + $0x38] sm:$0xff]  }
   0x4   :  { %v53_v12 = vmul.f32 %v228_v2, %v338_v1  ;;  %v54_v13 = vmul.f32 %v229_v3, %v338_v1  ;;  %v55_v16 = vmul.f32 %v232_v8, %v338_v1  ;;  %v56_v17 = vmul.f32 %v233_v9, %v338_v1  ;;  %v301_v28 = vld [vmem:[%s422_s0 + $0x20] sm:$0xff]  }
   0x5   :  { %v57_v18 = vmul.f32 %v236_v10, %v338_v1  ;;  %v58_v19 = vmul.f32 %v237_v11, %v338_v1  ;;  %v59_v22 = vmul.f32 %v240_v14, %v338_v1  ;;  %v60_v23 = vmul.f32 %v241_v15, %v338_v1 }
   0x6   :  { %v76_v20 = vadd.f32 %v352_v7, %v53_v12  ;;  %v77_v21 = vadd.f32 %v352_v7, %v54_v13  ;;  %v78_v24 = vadd.f32 %v352_v7, %v55_v16  ;;  %v79_v25 = vadd.f32 %v352_v7, %v56_v17 }
   0x7   :  { %v80_v26 = vadd.f32 %v352_v7, %v57_v18  ;;  %v81_v27 = vadd.f32 %v352_v7, %v58_v19  ;;  %v82_v31 = vadd.f32 %v352_v7, %v59_v22  ;;  %v83_v32 = vadd.f32 %v352_v7, %v60_v23 }
   0x8   :  { %v92_v29 = vmax.f32 %v76_v20, 0.0  ;;  %v93_v30 = vmax.f32 %v77_v21, 0.0  ;;  %v94_v34 = vmax.f32 %v78_v24, 0.0  ;;  %v95_v35 = vmax.f32 %v79_v25, 0.0 }
   0x9   :  { %v96_v36 = vmax.f32 %v80_v26, 0.0  ;;  %v97_v37 = vmax.f32 %v81_v27, 0.0  ;;  %v98_v40 = vmax.f32 %v82_v31, 0.0  ;;  %v99_v41 = vmax.f32 %v83_v32, 0.0 }
   0xa   :  { %v261_v39 = vpack.c.bf16 %v93_v30, %v92_v29  ;;  %v244_v42 = vunpack.c.l.bf16 %v301_v28  ;;  %v266_v44 = vpack.c.bf16 %v95_v35, %v94_v34  ;;  %v245_v46 = vunpack.c.h.bf16 %v301_v28 }
   0xb   :  { %v271_v45 = vpack.c.bf16 %v97_v37, %v96_v36  ;;  %v248_v47 = vunpack.c.l.bf16 %v302_v33  ;;  %v276_v48 = vpack.c.bf16 %v99_v41, %v98_v40  ;;  %v249_v50 = vunpack.c.h.bf16 %v302_v33 }
   0xc   :  { %262 = vst [vmem:[%s425_s3] sm:$0xff] %v261_v39   ;;  %v61_v49 = vmul.f32 %v244_v42, %v338_v1  ;;  %v252_v51 = vunpack.c.l.bf16 %v303_v38  ;;  %305 = vst [vmem:[%s425_s3 + $0x8] sm:$0xff] %v266_v44   ;;  %v62_v52 = vmul.f32 %v245_v46, %v338_v1  ;;  %v253_v54 = vunpack.c.h.bf16 %v303_v38 }
   0xd   :  { %306 = vst [vmem:[%s425_s3 + $0x10] sm:$0xff] %v271_v45   ;;  %v63_v53 = vmul.f32 %v248_v47, %v338_v1  ;;  %v256_v55 = vunpack.c.l.bf16 %v304_v43  ;;  %307 = vst [vmem:[%s425_s3 + $0x18] sm:$0xff] %v276_v48   ;;  %v64_v57 = vmul.f32 %v249_v50, %v338_v1  ;;  %v257_v59 = vunpack.c.h.bf16 %v304_v43 }
   0xe   :  { %v84_v56 = vadd.f32 %v352_v7, %v61_v49  ;;  %v65_v58 = vmul.f32 %v252_v51, %v338_v1  ;;  %v85_v60 = vadd.f32 %v352_v7, %v62_v52  ;;  %v66_v62 = vmul.f32 %v253_v54, %v338_v1 }
   0xf   :  { %v86_v61 = vadd.f32 %v352_v7, %v63_v53  ;;  %v67_v63 = vmul.f32 %v256_v55, %v338_v1  ;;  %v87_v2 = vadd.f32 %v352_v7, %v64_v57  ;;  %v68_v4 = vmul.f32 %v257_v59, %v338_v1 }
  0x10   :  { %v100_v0 = vmax.f32 %v84_v56, 0.0  ;;  %v88_v3 = vadd.f32 %v352_v7, %v65_v58  ;;  %v101_v5 = vmax.f32 %v85_v60, 0.0  ;;  %v89_v8 = vadd.f32 %v352_v7, %v66_v62 }
  0x11   :  { %v102_v6 = vmax.f32 %v86_v61, 0.0  ;;  %v90_v9 = vadd.f32 %v352_v7, %v67_v63  ;;  %v103_v10 = vmax.f32 %v87_v2, 0.0  ;;  %v91_v12 = vadd.f32 %v352_v7, %v68_v4 }
  0x12   :  { %v104_v11 = vmax.f32 %v88_v3, 0.0  ;;  %v281_v13 = vpack.c.bf16 %v101_v5, %v100_v0  ;;  %v105_v14 = vmax.f32 %v89_v8, 0.0 }
  0x13   :  { %v106_v15 = vmax.f32 %v90_v9, 0.0  ;;  %v286_v16 = vpack.c.bf16 %v103_v10, %v102_v6  ;;  %v107_v17 = vmax.f32 %v91_v12, 0.0 }
  0x14   :  { %308 = vst [vmem:[%s425_s3 + $0x20] sm:$0xff] %v281_v13   ;;  %v291_v1 = vpack.c.bf16 %v105_v14, %v104_v11 }
  0x15   :  { %309 = vst [vmem:[%s425_s3 + $0x28] sm:$0xff] %v286_v16   ;;  %v296_v18 = vpack.c.bf16 %v107_v17, %v106_v15 }
  0x16   :  { %310 = vst [vmem:[%s425_s3 + $0x30] sm:$0xff] %v291_v1  }
  0x17   :  { %311 = vst [vmem:[%s425_s3 + $0x38] sm:$0xff] %v296_v18  }

// kernel: basic_block_forward.5
= control target key start
LH: loop header
LB: loop body
LE: loop exit
PB: predicated region body
PF: predicated region fallthrough
CT: control target
= control target key end

     0   :  { %s662_s1 = inlined_call_operand.vmem [shape: bf16[128,128], index: 1, kind: input, shape index: {}]   ;;  %s663_s0 = inlined_call_operand.vmem [shape: bf16[128,128], index: 0, kind: input, shape index: {}]   ;;  %s664_s2 = inlined_call_operand.vmem [shape: bf16[128,128], index: 2, kind: output, shape index: {0}]   ;;  %s665_s3 = inlined_call_operand.vmem [shape: f32[8,128], index: 3, kind: output, shape index: {1}]  }
   0x1   :  { %v551_v0 = vld [vmem:[%s662_s1] sm:$0xff]   ;;  %v552_v1 = vld [vmem:[%s662_s1 + $0x8] sm:$0xff]   ;;  %v553_v2 = vld [vmem:[%s662_s1 + $0x10] sm:$0xff]  }
   0x2   :  { %503 = vmatprep.subr.bf16.mxu0 %v551_v0  ;;  %535 = vmatprep.subr.bf16.mxu1 %v551_v0  ;;  %v554_v3 = vld [vmem:[%s662_s1 + $0x18] sm:$0xff]   ;;  %v559_v4 = vld [vmem:[%s663_s0] sm:$0xff]   ;;  %v556_v7 = vld [vmem:[%s662_s1 + $0x28] sm:$0xff]  }
   0x3   :  { %504 = vmatpush3.bf16.msra.mxu0 %v551_v0  ;;  %543 = vmatpush3.bf16.msra.mxu1 %v551_v0  ;;  %v555_v5 = vld [vmem:[%s662_s1 + $0x20] sm:$0xff]   ;;  %v557_v8 = vld [vmem:[%s662_s1 + $0x30] sm:$0xff]   ;;  %v558_v9 = vld [vmem:[%s662_s1 + $0x38] sm:$0xff]  }
   0x4   :  { %505 = vmatprep.subr.bf16.mxu0 %v552_v1  ;;  %536 = vmatprep.subr.bf16.mxu1 %v552_v1  ;;  %v563_v6 = vld [vmem:[%s663_s0 + $0x20] sm:$0xff]   ;;  %v560_v10 = vld [vmem:[%s663_s0 + $0x8] sm:$0xff]   ;;  %v561_v12 = vld [vmem:[%s663_s0 + $0x10] sm:$0xff]  }
   0x5   :  { %519 = vmatprep.mubr.bf16.mxu0 %v559_v4  ;;  %527 = vmatprep.mubr.bf16.mxu1 %v563_v6  ;;  %v564_v11 = vld [vmem:[%s663_s0 + $0x28] sm:$0xff]   ;;  %v565_v13 = vld [vmem:[%s663_s0 + $0x30] sm:$0xff]   ;;  %v562_v14 = vld [vmem:[%s663_s0 + $0x18] sm:$0xff]  }
   0x6   :  { %v566_v15 = vld [vmem:[%s663_s0 + $0x38] sm:$0xff]  }
   0x7   :  { %506 = vmatpush3.bf16.msra.mxu0 %v552_v1  ;;  %544 = vmatpush3.bf16.msra.mxu1 %v552_v1 }
   0x8   :  { %507 = vmatprep.subr.bf16.mxu0 %v553_v2  ;;  %537 = vmatprep.subr.bf16.mxu1 %v553_v2 }
   0xb   :  { %508 = vmatpush3.bf16.msra.mxu0 %v553_v2  ;;  %545 = vmatpush3.bf16.msra.mxu1 %v553_v2 }
   0xc   :  { %509 = vmatprep.subr.bf16.mxu0 %v554_v3  ;;  %538 = vmatprep.subr.bf16.mxu1 %v554_v3 }
   0xf   :  { %510 = vmatpush3.bf16.msra.mxu0 %v554_v3  ;;  %546 = vmatpush3.bf16.msra.mxu1 %v554_v3 }
  0x10   :  { %511 = vmatprep.subr.bf16.mxu0 %v555_v5  ;;  %539 = vmatprep.subr.bf16.mxu1 %v555_v5 }
  0x13   :  { %512 = vmatpush3.bf16.msra.mxu0 %v555_v5  ;;  %547 = vmatpush3.bf16.msra.mxu1 %v555_v5 }
  0x14   :  { %513 = vmatprep.subr.bf16.mxu0 %v556_v7  ;;  %540 = vmatprep.subr.bf16.mxu1 %v556_v7 }
  0x17   :  { %514 = vmatpush3.bf16.msra.mxu0 %v556_v7  ;;  %548 = vmatpush3.bf16.msra.mxu1 %v556_v7 }
  0x18   :  { %515 = vmatprep.subr.bf16.mxu0 %v557_v8  ;;  %541 = vmatprep.subr.bf16.mxu1 %v557_v8 }
  0x1b   :  { %516 = vmatpush3.bf16.msra.mxu0 %v557_v8  ;;  %549 = vmatpush3.bf16.msra.mxu1 %v557_v8 }
  0x1c   :  { %517 = vmatprep.subr.bf16.mxu0 %v558_v9  ;;  %542 = vmatprep.subr.bf16.mxu1 %v558_v9 }
  0x1f   :  { %518 = vmatpush3.bf16.msra.mxu0 %v558_v9  ;;  %550 = vmatpush3.bf16.msra.mxu1 %v558_v9 }
  0x22   :  { %520 = vmatmul.mubr.bf16.vlgmr.msra.gmra.mrb[0].mxu0 %v560_v10  ;;  %528 = vmatmul.mubr.bf16.vlgmr.msra.gmra.mrb[0].mxu1 %v564_v11 }
  0x23   :  { %523 = vmatprep.mubr.bf16.mxu0 %v561_v12  ;;  %531 = vmatprep.mubr.bf16.mxu1 %v565_v13 }
  0x2a   :  { %524 = vmatmul.mubr.bf16.gmra.mrb[4].mxu0 %v562_v14  ;;  %532 = vmatmul.mubr.bf16.gmra.mrb[4].mxu1 %v566_v15 }
  0xf5   :  { %v521_v16 = vpop.f32.mrb[0].mxu0  ;;  %v529_v17 = vpop.f32.mrb[0].mxu1 }
  0xf6   :  { %v176_v18 = vpop.f32.mrb[1].mxu0  ;;  %v208_v19 = vpop.f32.mrb[1].mxu1  ;;  %v342_v31 = vmul.f32 %v521_v16, %v521_v16  ;;  %v350_v3 = vmul.f32 %v529_v17, %v529_v17 }
  0xf7   :  { %v522_v20 = vpop.f32.mrb[2].mxu0  ;;  %v530_v21 = vpop.f32.mrb[2].mxu1  ;;  %v340_v22 = vmul.f32 %v176_v18, %v176_v18  ;;  %v348_v61 = vmul.f32 %v208_v19, %v208_v19 }
  0xf8   :  { %v448_v23 = vpack.c.bf16 %v522_v20, %v521_v16  ;;  %v179_v24 = vpop.f32.mrb[3].mxu0  ;;  %v468_v25 = vpack.c.bf16 %v530_v21, %v529_v17  ;;  %v211_v26 = vpop.f32.mrb[3].mxu1  ;;  %v343_v34 = vmul.f32 %v522_v20, %v522_v20  ;;  %v351_v6 = vmul.f32 %v530_v21, %v530_v21 }
  0xf9   :  { %v443_v27 = vpack.c.bf16 %v179_v24, %v176_v18  ;;  %v319_v28 = vadd.f32 %v179_v24, %v176_v18  ;;  %v341_v29 = vmul.f32 %v179_v24, %v179_v24  ;;  %v463_v30 = vpack.c.bf16 %v211_v26, %v208_v19 }
  0xfa   :  { %480 = vst [vmem:[%s664_s2 + $0x8] sm:$0xff] %v448_v23   ;;  %484 = vst [vmem:[%s664_s2 + $0x28] sm:$0xff] %v468_v25   ;;  %v349_v2 = vmul.f32 %v211_v26, %v211_v26 }
  0xfb   :  { %444 = vst [vmem:[%s664_s2] sm:$0xff] %v443_v27   ;;  %v320_v32 = vadd.f32 %v521_v16, %v319_v28  ;;  %v356_v33 = vadd.f32 %v341_v29, %v340_v22  ;;  %483 = vst [vmem:[%s664_s2 + $0x20] sm:$0xff] %v463_v30  }
  0xfd   :  { %v357_v35 = vadd.f32 %v356_v33, %v342_v31  ;;  %v525_v36 = vpop.f32.mrb[4].mxu0  ;;  %v321_v37 = vadd.f32 %v522_v20, %v320_v32  ;;  %v533_v38 = vpop.f32.mrb[4].mxu1 }
  0xfe   :  { %v192_v39 = vpop.f32.mrb[5].mxu0  ;;  %v224_v40 = vpop.f32.mrb[5].mxu1  ;;  %v346_v55 = vmul.f32 %v525_v36, %v525_v36  ;;  %v354_v15 = vmul.f32 %v533_v38, %v533_v38 }
  0xff   :  { %v322_v41 = vadd.f32 %v321_v37, %v192_v39  ;;  %v344_v42 = vmul.f32 %v192_v39, %v192_v39  ;;  %v358_v43 = vadd.f32 %v357_v35, %v343_v34  ;;  %v526_v44 = vpop.f32.mrb[6].mxu0  ;;  %v534_v45 = vpop.f32.mrb[6].mxu1  ;;  %v352_v9 = vmul.f32 %v224_v40, %v224_v40 }
 0x100   :  { %v458_v46 = vpack.c.bf16 %v526_v44, %v525_v36  ;;  %v195_v47 = vpop.f32.mrb[7].mxu0  ;;  %v478_v48 = vpack.c.bf16 %v534_v45, %v533_v38  ;;  %v227_v49 = vpop.f32.mrb[7].mxu1  ;;  %v347_v58 = vmul.f32 %v526_v44, %v526_v44 }
 0x101   :  { %v359_v50 = vadd.f32 %v358_v43, %v344_v42  ;;  %v453_v51 = vpack.c.bf16 %v195_v47, %v192_v39  ;;  %v323_v52 = vadd.f32 %v322_v41, %v195_v47  ;;  %v345_v53 = vmul.f32 %v195_v47, %v195_v47 }
 0x102   :  { %482 = vst [vmem:[%s664_s2 + $0x18] sm:$0xff] %v458_v46   ;;  %486 = vst [vmem:[%s664_s2 + $0x38] sm:$0xff] %v478_v48   ;;  %v473_v54 = vpack.c.bf16 %v227_v49, %v224_v40  ;;  %v353_v14 = vmul.f32 %v227_v49, %v227_v49 }
 0x103   :  { %481 = vst [vmem:[%s664_s2 + $0x10] sm:$0xff] %v453_v51   ;;  %v324_v56 = vadd.f32 %v525_v36, %v323_v52  ;;  %v360_v57 = vadd.f32 %v359_v50, %v345_v53 }
 0x104   :  { %485 = vst [vmem:[%s664_s2 + $0x30] sm:$0xff] %v473_v54  }
 0x105   :  { %v361_v59 = vadd.f32 %v360_v57, %v346_v55  ;;  %v325_v60 = vadd.f32 %v526_v44, %v324_v56 }
 0x107   :  { %v326_v62 = vadd.f32 %v325_v60, %v208_v19  ;;  %v362_v63 = vadd.f32 %v361_v59, %v347_v58  ;;  %v355_v19 = vmul.f32 %v534_v45, %v534_v45 }
 0x109   :  { %v363_v0 = vadd.f32 %v362_v63, %v348_v61  ;;  %v327_v1 = vadd.f32 %v326_v62, %v211_v26  ;;  %v377_v26 = vlaneseq }
 0x10b   :  { %v328_v4 = vadd.f32 %v529_v17, %v327_v1  ;;  %v364_v5 = vadd.f32 %v363_v0, %v349_v2  ;;  %v378_v30 = vshrl.u32 %v377_v26, 7 }
 0x10d   :  { %v365_v7 = vadd.f32 %v364_v5, %v350_v3  ;;  %v329_v8 = vadd.f32 %v530_v21, %v328_v4  ;;  %vm380_vm0 = vcmp.eq.s32.totalorder %v378_v30, 1  ;;  %vm379_vm1 = vcmp.eq.s32.totalorder %v378_v30, 0 }
 0x10f   :  { %v330_v10 = vadd.f32 %v329_v8, %v224_v40  ;;  %v366_v11 = vadd.f32 %v365_v7, %v351_v6 }
 0x111   :  { %v367_v12 = vadd.f32 %v366_v11, %v352_v9  ;;  %v331_v13 = vadd.f32 %v330_v10, %v227_v49 }
 0x113   :  { %v332_v16 = vadd.f32 %v533_v38, %v331_v13  ;;  %v368_v18 = vadd.f32 %v367_v12, %v353_v14 }
 0x115   :  { %v333_v20 = vadd.f32 %v534_v45, %v332_v16  ;;  %v369_v22 = vadd.f32 %v368_v18, %v354_v15 }
 0x117   :  { %v334_v23 = vrot.slane %v333_v20, 4  ;;  %v370_v24 = vadd.f32 %v369_v22, %v355_v19 }
 0x119   :  { %v335_v25 = vadd.f32 %v334_v23, %v333_v20  ;;  %v371_v17 = vrot.slane %v370_v24, 4 }
 0x11b   :  { %v336_v27 = vrot.slane %v335_v25, 2  ;;  %v372_v28 = vadd.f32 %v371_v17, %v370_v24 }
 0x11d   :  { %v337_v21 = vadd.f32 %v336_v27, %v335_v25  ;;  %v373_v29 = vrot.slane %v372_v28, 2 }
 0x11f   :  { %v374_v31 = vadd.f32 %v373_v29, %v372_v28  ;;  %v338_v32 = vrot.slane %v337_v21, 1 }
 0x121   :  { %v375_v33 = vrot.slane %v374_v31, 1  ;;  %v339_v35 = vadd.f32 %v338_v32, %v337_v21 }
 0x123   :  { %v376_v34 = vadd.f32 %v375_v33, %v374_v31 }
 0x125   :  { %v381_v36 = vsel %vm380_vm0, %v376_v34, 0.0 }
 0x126   :  { %v382_v37 = vsel %vm379_vm1, %v339_v35, %v381_v36 }
 0x127   :  { %383 = vst [vmem:[%s665_s3] sm:$0xff] %v382_v37 }

// kernel: basic_block_forward.9
= control target key start
LH: loop header
LB: loop body
LE: loop exit
PB: predicated region body
PF: predicated region fallthrough
CT: control target
= control target key end

     0   :  { %s799_s4 = inlined_call_operand.vmem [shape: bf16[128,128], index: 4, kind: input, shape index: {}]   ;;  %s800_s3 = inlined_call_operand.vmem [shape: bf16[128,128], index: 3, kind: input, shape index: {}]   ;;  %s801_s0 = inlined_call_operand.vmem [shape: bf16[128,128], index: 0, kind: input, shape index: {}]   ;;  %s802_s1 = inlined_call_operand.vmem [shape: f32[1,128], index: 1, kind: input, shape index: {}]   ;;  %s803_s2 = inlined_call_operand.vmem [shape: f32[1,128], index: 2, kind: input, shape index: {}]   ;;  %s804_s5 = inlined_call_operand.vmem [shape: f32[1,128], index: 5, kind: input, shape index: {}]   ;;  %s805_s6 = inlined_call_operand.vmem [shape: f32[1,128], index: 6, kind: input, shape index: {}]   ;;  %s806_s7 = inlined_call_operand.vmem [shape: f32[128,128], index: 7, kind: output, shape index: {}]  }
   0x1   :  { %v551_v0 = vld [vmem:[%s799_s4] sm:$0xff]   ;;  %v552_v1 = vld [vmem:[%s799_s4 + $0x8] sm:$0xff]   ;;  %v553_v2 = vld [vmem:[%s799_s4 + $0x10] sm:$0xff]  }
   0x2   :  { %503 = vmatprep.subr.bf16.mxu0 %v551_v0  ;;  %535 = vmatprep.subr.bf16.mxu1 %v551_v0  ;;  %v554_v3 = vld [vmem:[%s799_s4 + $0x18] sm:$0xff]   ;;  %v559_v4 = vld [vmem:[%s800_s3] sm:$0xff]   ;;  %v556_v7 = vld [vmem:[%s799_s4 + $0x28] sm:$0xff]  }
   0x3   :  { %504 = vmatpush3.bf16.msra.mxu0 %v551_v0  ;;  %543 = vmatpush3.bf16.msra.mxu1 %v551_v0  ;;  %v560_v5 = vld [vmem:[%s800_s3 + $0x20] sm:$0xff]   ;;  %v557_v8 = vld [vmem:[%s799_s4 + $0x30] sm:$0xff]   ;;  %v558_v9 = vld [vmem:[%s799_s4 + $0x38] sm:$0xff]  }
   0x4   :  { %505 = vmatprep.subr.bf16.mxu0 %v552_v1  ;;  %536 = vmatprep.subr.bf16.mxu1 %v552_v1  ;;  %v555_v6 = vld [vmem:[%s799_s4 + $0x20] sm:$0xff]   ;;  %v561_v10 = vld [vmem:[%s800_s3 + $0x8] sm:$0xff]   ;;  %v563_v12 = vld [vmem:[%s800_s3 + $0x10] sm:$0xff]  }
   0x5   :  { %519 = vmatprep.mubr.bf16.mxu0 %v559_v4  ;;  %527 = vmatprep.mubr.bf16.mxu1 %v560_v5  ;;  %v562_v11 = vld [vmem:[%s800_s3 + $0x28] sm:$0xff]   ;;  %v564_v13 = vld [vmem:[%s800_s3 + $0x30] sm:$0xff]   ;;  %v565_v14 = vld [vmem:[%s800_s3 + $0x18] sm:$0xff]  }
   0x6   :  { %v566_v15 = vld [vmem:[%s800_s3 + $0x38] sm:$0xff]   ;;  %v480_v16 = vld [vmem:[%s801_s0 + $0x8] sm:$0xff]   ;;  %v449_v18 = vld [vmem:[%s801_s0] sm:$0xff]  }
   0x7   :  { %506 = vmatpush3.bf16.msra.mxu0 %v552_v1  ;;  %544 = vmatpush3.bf16.msra.mxu1 %v552_v1  ;;  %v484_v17 = vld [vmem:[%s801_s0 + $0x28] sm:$0xff]   ;;  %v483_v19 = vld [vmem:[%s801_s0 + $0x20] sm:$0xff]   ;;  %v482_v20 = vld [vmem:[%s801_s0 + $0x18] sm:$0xff]   ;;  %v454_v21 = vunpack.c.l.bf16 %v480_v16  ;;  %v450_v27 = vunpack.c.l.bf16 %v449_v18  ;;  %v455_v29 = vunpack.c.h.bf16 %v480_v16  ;;  %v451_v31 = vunpack.c.h.bf16 %v449_v18 }
   0x8   :  { %507 = vmatprep.subr.bf16.mxu0 %v553_v2  ;;  %537 = vmatprep.subr.bf16.mxu1 %v553_v2  ;;  %v470_v22 = vunpack.c.l.bf16 %v484_v17  ;;  %v486_v23 = vld [vmem:[%s801_s0 + $0x38] sm:$0xff]   ;;  %v481_v24 = vld [vmem:[%s801_s0 + $0x10] sm:$0xff]   ;;  %v444_v26 = vld [vmem:[%s802_s1] ss:$0 sm:$0xff]  ;;  %v466_v28 = vunpack.c.l.bf16 %v483_v19  ;;  %v471_v30 = vunpack.c.h.bf16 %v484_v17  ;;  %v467_v32 = vunpack.c.h.bf16 %v483_v19 }
   0x9   :  { %v485_v25 = vld [vmem:[%s801_s0 + $0x30] sm:$0xff]   ;;  %v462_v33 = vunpack.c.l.bf16 %v482_v20  ;;  %v478_v34 = vunpack.c.l.bf16 %v486_v23  ;;  %v458_v35 = vunpack.c.l.bf16 %v481_v24  ;;  %v293_v37 = vmul.f32 %v454_v21, %v444_v26  ;;  %v445_v41 = vld [vmem:[%s803_s2] ss:$0 sm:$0xff] }
   0xa   :  { %v474_v36 = vunpack.c.l.bf16 %v485_v25  ;;  %v301_v38 = vmul.f32 %v470_v22, %v444_v26  ;;  %v463_v39 = vunpack.c.h.bf16 %v482_v20  ;;  %v479_v40 = vunpack.c.h.bf16 %v486_v23  ;;  %v688_v58 = vld [vmem:[%s804_s5] ss:$0 sm:$0xff] }
   0xb   :  { %508 = vmatpush3.bf16.msra.mxu0 %v553_v2  ;;  %545 = vmatpush3.bf16.msra.mxu1 %v553_v2  ;;  %v291_v42 = vmul.f32 %v450_v27, %v444_v26  ;;  %v299_v43 = vmul.f32 %v466_v28, %v444_v26  ;;  %v459_v44 = vunpack.c.h.bf16 %v481_v24  ;;  %v475_v45 = vunpack.c.h.bf16 %v485_v25 }
   0xc   :  { %509 = vmatprep.subr.bf16.mxu0 %v554_v3  ;;  %538 = vmatprep.subr.bf16.mxu1 %v554_v3  ;;  %v294_v46 = vmul.f32 %v455_v29, %v444_v26  ;;  %v302_v47 = vmul.f32 %v471_v30, %v444_v26  ;;  %v292_v48 = vmul.f32 %v451_v31, %v444_v26 }
   0xd   :  { %v300_v49 = vmul.f32 %v467_v32, %v444_v26  ;;  %v297_v50 = vmul.f32 %v462_v33, %v444_v26  ;;  %v305_v51 = vmul.f32 %v478_v34, %v444_v26  ;;  %v295_v52 = vmul.f32 %v458_v35, %v444_v26 }
   0xe   :  { %v303_v53 = vmul.f32 %v474_v36, %v444_v26  ;;  %v316_v54 = vadd.f32 %v445_v41, %v293_v37  ;;  %v324_v55 = vadd.f32 %v445_v41, %v301_v38  ;;  %v298_v56 = vmul.f32 %v463_v39, %v444_v26 }
   0xf   :  { %510 = vmatpush3.bf16.msra.mxu0 %v554_v3  ;;  %546 = vmatpush3.bf16.msra.mxu1 %v554_v3  ;;  %v306_v57 = vmul.f32 %v479_v40, %v444_v26  ;;  %v314_v59 = vadd.f32 %v445_v41, %v291_v42  ;;  %v322_v60 = vadd.f32 %v445_v41, %v299_v43 }
  0x10   :  { %511 = vmatprep.subr.bf16.mxu0 %v555_v6  ;;  %539 = vmatprep.subr.bf16.mxu1 %v555_v6  ;;  %v296_v61 = vmul.f32 %v459_v44, %v444_v26  ;;  %v304_v62 = vmul.f32 %v475_v45, %v444_v26  ;;  %v317_v63 = vadd.f32 %v445_v41, %v294_v46 }
  0x11   :  { %v325_v0 = vadd.f32 %v445_v41, %v302_v47  ;;  %v315_v1 = vadd.f32 %v445_v41, %v292_v48  ;;  %v323_v2 = vadd.f32 %v445_v41, %v300_v49  ;;  %v690_v5 = vadd.f32 %v445_v41, %v297_v50 }
  0x12   :  { %v711_v20 = vadd.f32 %v445_v41, %v296_v61  ;;  %v713_v21 = vadd.f32 %v445_v41, %v304_v62 }
  0x13   :  { %512 = vmatpush3.bf16.msra.mxu0 %v555_v6  ;;  %547 = vmatpush3.bf16.msra.mxu1 %v555_v6  ;;  %v692_v6 = vadd.f32 %v445_v41, %v305_v51 }
  0x14   :  { %513 = vmatprep.subr.bf16.mxu0 %v556_v7  ;;  %540 = vmatprep.subr.bf16.mxu1 %v556_v7 }
  0x17   :  { %514 = vmatpush3.bf16.msra.mxu0 %v556_v7  ;;  %548 = vmatpush3.bf16.msra.mxu1 %v556_v7  ;;  %v694_v7 = vadd.f32 %v445_v41, %v295_v52 }
  0x18   :  { %515 = vmatprep.subr.bf16.mxu0 %v557_v8  ;;  %541 = vmatprep.subr.bf16.mxu1 %v557_v8 }
  0x1b   :  { %516 = vmatpush3.bf16.msra.mxu0 %v557_v8  ;;  %549 = vmatpush3.bf16.msra.mxu1 %v557_v8  ;;  %v696_v8 = vadd.f32 %v445_v41, %v303_v53 }
  0x1c   :  { %517 = vmatprep.subr.bf16.mxu0 %v558_v9  ;;  %542 = vmatprep.subr.bf16.mxu1 %v558_v9 }
  0x1f   :  { %518 = vmatpush3.bf16.msra.mxu0 %v558_v9  ;;  %550 = vmatpush3.bf16.msra.mxu1 %v558_v9 }
  0x22   :  { %520 = vmatmul.mubr.bf16.vlgmr.msra.gmra.mrb[0].mxu0 %v561_v10  ;;  %528 = vmatmul.mubr.bf16.vlgmr.msra.gmra.mrb[0].mxu1 %v562_v11 }
  0x23   :  { %523 = vmatprep.mubr.bf16.mxu0 %v563_v12  ;;  %531 = vmatprep.mubr.bf16.mxu1 %v564_v13  ;;  %v700_v13 = vadd.f32 %v445_v41, %v298_v56 }
  0x2a   :  { %524 = vmatmul.mubr.bf16.gmra.mrb[4].mxu0 %v565_v14  ;;  %532 = vmatmul.mubr.bf16.gmra.mrb[4].mxu1 %v566_v15  ;;  %v702_v14 = vadd.f32 %v445_v41, %v306_v57  ;;  %v707_v15 = vld [vmem:[%s805_s6] ss:$0 sm:$0xff] }
  0xf5   :  { %v521_v3 = vpop.f32.mrb[0].mxu0  ;;  %v529_v4 = vpop.f32.mrb[0].mxu1 }
  0xf6   :  { %v339_v9 = vmul.f32 %v521_v3, %v688_v58  ;;  %v347_v10 = vmul.f32 %v529_v4, %v688_v58  ;;  %v189_v11 = vpop.f32.mrb[1].mxu0  ;;  %v221_v12 = vpop.f32.mrb[1].mxu1 }
  0xf7   :  { %v337_v16 = vmul.f32 %v688_v58, %v189_v11  ;;  %v345_v17 = vmul.f32 %v688_v58, %v221_v12  ;;  %v522_v18 = vpop.f32.mrb[2].mxu0  ;;  %v530_v19 = vpop.f32.mrb[2].mxu1 }
  0xf8   :  { %v355_v22 = vadd.f32 %v339_v9, %v316_v54  ;;  %v363_v23 = vadd.f32 %v347_v10, %v324_v55  ;;  %v340_v24 = vmul.f32 %v522_v18, %v688_v58  ;;  %v348_v25 = vmul.f32 %v530_v19, %v688_v58  ;;  %v192_v26 = vpop.f32.mrb[3].mxu0  ;;  %v224_v27 = vpop.f32.mrb[3].mxu1 }
  0xf9   :  { %v353_v28 = vadd.f32 %v337_v16, %v314_v59  ;;  %v361_v29 = vadd.f32 %v345_v17, %v322_v60  ;;  %v338_v30 = vmul.f32 %v688_v58, %v192_v26  ;;  %v346_v31 = vmul.f32 %v688_v58, %v224_v27 }
  0xfa   :  { %v378_v32 = vadd.f32 %v707_v15, %v355_v22  ;;  %v386_v33 = vadd.f32 %v707_v15, %v363_v23  ;;  %v356_v34 = vadd.f32 %v340_v24, %v317_v63  ;;  %v364_v35 = vadd.f32 %v348_v25, %v325_v0 }
  0xfb   :  { %v376_v36 = vadd.f32 %v707_v15, %v353_v28  ;;  %v384_v37 = vadd.f32 %v707_v15, %v361_v29  ;;  %v354_v38 = vadd.f32 %v338_v30, %v315_v1  ;;  %v362_v39 = vadd.f32 %v346_v31, %v323_v2 }
  0xfc   :  { %v394_v40 = vmax.f32 %v378_v32, 0.0  ;;  %v402_v41 = vmax.f32 %v386_v33, 0.0  ;;  %v379_v42 = vadd.f32 %v707_v15, %v356_v34  ;;  %v387_v43 = vadd.f32 %v707_v15, %v364_v35 }
  0xfd   :  { %v392_v44 = vmax.f32 %v376_v36, 0.0  ;;  %v400_v45 = vmax.f32 %v384_v37, 0.0  ;;  %v377_v46 = vadd.f32 %v707_v15, %v354_v38  ;;  %v385_v47 = vadd.f32 %v707_v15, %v362_v39  ;;  %v525_v48 = vpop.f32.mrb[4].mxu0  ;;  %v533_v49 = vpop.f32.mrb[4].mxu1 }
  0xfe   :  { %410 = vst [vmem:[%s806_s7 + $0x10] sm:$0xff] %v394_v40  ;;  %418 = vst [vmem:[%s806_s7 + $0x50] sm:$0xff] %v402_v41  ;;  %v395_v50 = vmax.f32 %v379_v42, 0.0  ;;  %v403_v51 = vmax.f32 %v387_v43, 0.0  ;;  %v343_v52 = vmul.f32 %v525_v48, %v688_v58  ;;  %v351_v53 = vmul.f32 %v533_v49, %v688_v58  ;;  %v205_v54 = vpop.f32.mrb[5].mxu0  ;;  %v237_v55 = vpop.f32.mrb[5].mxu1 }
  0xff   :  { %408 = vst [vmem:[%s806_s7] sm:$0xff] %v392_v44  ;;  %416 = vst [vmem:[%s806_s7 + $0x40] sm:$0xff] %v400_v45  ;;  %v393_v56 = vmax.f32 %v377_v46, 0.0  ;;  %v401_v57 = vmax.f32 %v385_v47, 0.0  ;;  %v341_v59 = vmul.f32 %v688_v58, %v205_v54  ;;  %v349_v60 = vmul.f32 %v688_v58, %v237_v55  ;;  %v526_v61 = vpop.f32.mrb[6].mxu0  ;;  %v534_v62 = vpop.f32.mrb[6].mxu1 }
 0x100   :  { %411 = vst [vmem:[%s806_s7 + $0x18] sm:$0xff] %v395_v50  ;;  %419 = vst [vmem:[%s806_s7 + $0x58] sm:$0xff] %v403_v51  ;;  %v359_v63 = vadd.f32 %v343_v52, %v690_v5  ;;  %v367_v0 = vadd.f32 %v351_v53, %v692_v6  ;;  %v344_v1 = vmul.f32 %v526_v61, %v688_v58  ;;  %v208_v3 = vpop.f32.mrb[7].mxu0  ;;  %v240_v4 = vpop.f32.mrb[7].mxu1 }
 0x101   :  { %v352_v2 = vmul.f32 %v534_v62, %v688_v58  ;;  %409 = vst [vmem:[%s806_s7 + $0x8] sm:$0xff] %v393_v56  ;;  %417 = vst [vmem:[%s806_s7 + $0x48] sm:$0xff] %v401_v57  ;;  %v357_v9 = vadd.f32 %v341_v59, %v694_v7  ;;  %v365_v5 = vadd.f32 %v349_v60, %v696_v8 }
 0x102   :  { %v342_v6 = vmul.f32 %v688_v58, %v208_v3  ;;  %v350_v10 = vmul.f32 %v688_v58, %v240_v4  ;;  %v382_v11 = vadd.f32 %v707_v15, %v359_v63  ;;  %v390_v12 = vadd.f32 %v707_v15, %v367_v0 }
 0x103   :  { %v360_v16 = vadd.f32 %v344_v1, %v700_v13  ;;  %v368_v17 = vadd.f32 %v352_v2, %v702_v14  ;;  %v380_v18 = vadd.f32 %v707_v15, %v357_v9  ;;  %v388_v19 = vadd.f32 %v707_v15, %v365_v5 }
 0x104   :  { %v358_v7 = vadd.f32 %v342_v6, %v711_v20  ;;  %v366_v8 = vadd.f32 %v350_v10, %v713_v21  ;;  %v398_v22 = vmax.f32 %v382_v11, 0.0  ;;  %v406_v23 = vmax.f32 %v390_v12, 0.0 }
 0x105   :  { %v383_v58 = vadd.f32 %v707_v15, %v360_v16  ;;  %v391_v24 = vadd.f32 %v707_v15, %v368_v17  ;;  %v396_v25 = vmax.f32 %v380_v18, 0.0  ;;  %v404_v26 = vmax.f32 %v388_v19, 0.0 }
 0x106   :  { %v381_v13 = vadd.f32 %v707_v15, %v358_v7  ;;  %v389_v14 = vadd.f32 %v707_v15, %v366_v8  ;;  %414 = vst [vmem:[%s806_s7 + $0x30] sm:$0xff] %v398_v22  ;;  %422 = vst [vmem:[%s806_s7 + $0x70] sm:$0xff] %v406_v23 }
 0x107   :  { %v399_v20 = vmax.f32 %v383_v58, 0.0  ;;  %v407_v21 = vmax.f32 %v391_v24, 0.0  ;;  %412 = vst [vmem:[%s806_s7 + $0x20] sm:$0xff] %v396_v25  ;;  %420 = vst [vmem:[%s806_s7 + $0x60] sm:$0xff] %v404_v26 }
 0x108   :  { %v397_v27 = vmax.f32 %v381_v13, 0.0  ;;  %v405_v15 = vmax.f32 %v389_v14, 0.0 }
 0x109   :  { %415 = vst [vmem:[%s806_s7 + $0x38] sm:$0xff] %v399_v20  ;;  %423 = vst [vmem:[%s806_s7 + $0x78] sm:$0xff] %v407_v21 }
 0x10a   :  { %413 = vst [vmem:[%s806_s7 + $0x28] sm:$0xff] %v397_v27  ;;  %421 = vst [vmem:[%s806_s7 + $0x68] sm:$0xff] %v405_v15 }

// kernel: basic_block_forward.8
= control target key start
LH: loop header
LB: loop body
LE: loop exit
PB: predicated region body
PF: predicated region fallthrough
CT: control target
= control target key end

     0   :  { %s468_s1 = inlined_call_operand.vmem [shape: bf16[128,128], index: 1, kind: input, shape index: {}]   ;;  %s469_s0 = inlined_call_operand.vmem [shape: bf16[128,128], index: 0, kind: input, shape index: {}]   ;;  %s470_s2 = inlined_call_operand.vmem [shape: f32[8,128], index: 2, kind: output, shape index: {}]  }
   0x1   :  { %v386_v0 = vld [vmem:[%s468_s1] sm:$0xff]   ;;  %v387_v1 = vld [vmem:[%s468_s1 + $0x8] sm:$0xff]   ;;  %v388_v2 = vld [vmem:[%s468_s1 + $0x10] sm:$0xff]  }
   0x2   :  { %338 = vmatprep.subr.bf16.mxu0 %v386_v0  ;;  %370 = vmatprep.subr.bf16.mxu1 %v386_v0  ;;  %v389_v3 = vld [vmem:[%s468_s1 + $0x18] sm:$0xff]   ;;  %v394_v4 = vld [vmem:[%s469_s0] sm:$0xff]   ;;  %v391_v7 = vld [vmem:[%s468_s1 + $0x28] sm:$0xff]  }
   0x3   :  { %339 = vmatpush3.bf16.msra.mxu0 %v386_v0  ;;  %378 = vmatpush3.bf16.msra.mxu1 %v386_v0  ;;  %v390_v5 = vld [vmem:[%s468_s1 + $0x20] sm:$0xff]   ;;  %v392_v8 = vld [vmem:[%s468_s1 + $0x30] sm:$0xff]   ;;  %v393_v9 = vld [vmem:[%s468_s1 + $0x38] sm:$0xff]  }
   0x4   :  { %340 = vmatprep.subr.bf16.mxu0 %v387_v1  ;;  %371 = vmatprep.subr.bf16.mxu1 %v387_v1  ;;  %v398_v6 = vld [vmem:[%s469_s0 + $0x20] sm:$0xff]   ;;  %v395_v10 = vld [vmem:[%s469_s0 + $0x8] sm:$0xff]   ;;  %v396_v12 = vld [vmem:[%s469_s0 + $0x10] sm:$0xff]  }
   0x5   :  { %354 = vmatprep.mubr.bf16.mxu0 %v394_v4  ;;  %362 = vmatprep.mubr.bf16.mxu1 %v398_v6  ;;  %v399_v11 = vld [vmem:[%s469_s0 + $0x28] sm:$0xff]   ;;  %v400_v13 = vld [vmem:[%s469_s0 + $0x30] sm:$0xff]   ;;  %v397_v14 = vld [vmem:[%s469_s0 + $0x18] sm:$0xff]  }
   0x6   :  { %v401_v15 = vld [vmem:[%s469_s0 + $0x38] sm:$0xff]  }
   0x7   :  { %341 = vmatpush3.bf16.msra.mxu0 %v387_v1  ;;  %379 = vmatpush3.bf16.msra.mxu1 %v387_v1 }
   0x8   :  { %342 = vmatprep.subr.bf16.mxu0 %v388_v2  ;;  %372 = vmatprep.subr.bf16.mxu1 %v388_v2 }
   0xb   :  { %343 = vmatpush3.bf16.msra.mxu0 %v388_v2  ;;  %380 = vmatpush3.bf16.msra.mxu1 %v388_v2 }
   0xc   :  { %344 = vmatprep.subr.bf16.mxu0 %v389_v3  ;;  %373 = vmatprep.subr.bf16.mxu1 %v389_v3 }
   0xf   :  { %345 = vmatpush3.bf16.msra.mxu0 %v389_v3  ;;  %381 = vmatpush3.bf16.msra.mxu1 %v389_v3 }
  0x10   :  { %346 = vmatprep.subr.bf16.mxu0 %v390_v5  ;;  %374 = vmatprep.subr.bf16.mxu1 %v390_v5 }
  0x13   :  { %347 = vmatpush3.bf16.msra.mxu0 %v390_v5  ;;  %382 = vmatpush3.bf16.msra.mxu1 %v390_v5 }
  0x14   :  { %348 = vmatprep.subr.bf16.mxu0 %v391_v7  ;;  %375 = vmatprep.subr.bf16.mxu1 %v391_v7 }
  0x17   :  { %349 = vmatpush3.bf16.msra.mxu0 %v391_v7  ;;  %383 = vmatpush3.bf16.msra.mxu1 %v391_v7 }
  0x18   :  { %350 = vmatprep.subr.bf16.mxu0 %v392_v8  ;;  %376 = vmatprep.subr.bf16.mxu1 %v392_v8 }
  0x1b   :  { %351 = vmatpush3.bf16.msra.mxu0 %v392_v8  ;;  %384 = vmatpush3.bf16.msra.mxu1 %v392_v8 }
  0x1c   :  { %352 = vmatprep.subr.bf16.mxu0 %v393_v9  ;;  %377 = vmatprep.subr.bf16.mxu1 %v393_v9 }
  0x1f   :  { %353 = vmatpush3.bf16.msra.mxu0 %v393_v9  ;;  %385 = vmatpush3.bf16.msra.mxu1 %v393_v9 }
  0x22   :  { %355 = vmatmul.mubr.bf16.vlgmr.msra.gmra.mrb[0].mxu0 %v395_v10  ;;  %363 = vmatmul.mubr.bf16.vlgmr.msra.gmra.mrb[0].mxu1 %v399_v11 }
  0x23   :  { %358 = vmatprep.mubr.bf16.mxu0 %v396_v12  ;;  %366 = vmatprep.mubr.bf16.mxu1 %v400_v13 }
  0x2a   :  { %359 = vmatmul.mubr.bf16.gmra.mrb[4].mxu0 %v397_v14  ;;  %367 = vmatmul.mubr.bf16.gmra.mrb[4].mxu1 %v401_v15 }
  0xf5   :  { %v356_v16 = vpop.f32.mrb[0].mxu0  ;;  %v364_v17 = vpop.f32.mrb[0].mxu1 }
  0xf6   :  { %v174_v18 = vpop.f32.mrb[1].mxu0  ;;  %v206_v19 = vpop.f32.mrb[1].mxu1  ;;  %v260_v27 = vmul.f32 %v356_v16, %v356_v16  ;;  %v268_v59 = vmul.f32 %v364_v17, %v364_v17 }
  0xf7   :  { %v357_v20 = vpop.f32.mrb[2].mxu0  ;;  %v365_v21 = vpop.f32.mrb[2].mxu1  ;;  %v258_v24 = vmul.f32 %v174_v18, %v174_v18  ;;  %v266_v53 = vmul.f32 %v206_v19, %v206_v19 }
  0xf8   :  { %v177_v22 = vpop.f32.mrb[3].mxu0  ;;  %v209_v23 = vpop.f32.mrb[3].mxu1  ;;  %v261_v30 = vmul.f32 %v357_v20, %v357_v20  ;;  %v269_v62 = vmul.f32 %v365_v21, %v365_v21 }
  0xf9   :  { %v237_v25 = vadd.f32 %v177_v22, %v174_v18  ;;  %v259_v26 = vmul.f32 %v177_v22, %v177_v22  ;;  %v267_v58 = vmul.f32 %v209_v23, %v209_v23 }
  0xfb   :  { %v238_v28 = vadd.f32 %v356_v16, %v237_v25  ;;  %v274_v29 = vadd.f32 %v259_v26, %v258_v24 }
  0xfd   :  { %v275_v31 = vadd.f32 %v274_v29, %v260_v27  ;;  %v360_v32 = vpop.f32.mrb[4].mxu0  ;;  %v239_v33 = vadd.f32 %v357_v20, %v238_v28  ;;  %v368_v34 = vpop.f32.mrb[4].mxu1 }
  0xfe   :  { %v190_v35 = vpop.f32.mrb[5].mxu0  ;;  %v222_v36 = vpop.f32.mrb[5].mxu1  ;;  %v264_v47 = vmul.f32 %v360_v32, %v360_v32  ;;  %v272_v7 = vmul.f32 %v368_v34, %v368_v34 }
  0xff   :  { %v240_v37 = vadd.f32 %v239_v33, %v190_v35  ;;  %v262_v38 = vmul.f32 %v190_v35, %v190_v35  ;;  %v276_v39 = vadd.f32 %v275_v31, %v261_v30  ;;  %v361_v40 = vpop.f32.mrb[6].mxu0  ;;  %v369_v41 = vpop.f32.mrb[6].mxu1  ;;  %v270_v1 = vmul.f32 %v222_v36, %v222_v36 }
 0x100   :  { %v193_v42 = vpop.f32.mrb[7].mxu0  ;;  %v225_v43 = vpop.f32.mrb[7].mxu1  ;;  %v265_v50 = vmul.f32 %v361_v40, %v361_v40  ;;  %v273_v10 = vmul.f32 %v369_v41, %v369_v41 }
 0x101   :  { %v277_v44 = vadd.f32 %v276_v39, %v262_v38  ;;  %v241_v45 = vadd.f32 %v240_v37, %v193_v42  ;;  %v263_v46 = vmul.f32 %v193_v42, %v193_v42  ;;  %v271_v6 = vmul.f32 %v225_v43, %v225_v43 }
 0x103   :  { %v242_v48 = vadd.f32 %v360_v32, %v241_v45  ;;  %v278_v49 = vadd.f32 %v277_v44, %v263_v46 }
 0x105   :  { %v279_v51 = vadd.f32 %v278_v49, %v264_v47  ;;  %v243_v52 = vadd.f32 %v361_v40, %v242_v48 }
 0x107   :  { %v244_v54 = vadd.f32 %v243_v52, %v206_v19  ;;  %v280_v55 = vadd.f32 %v279_v51, %v265_v50 }
 0x109   :  { %v281_v56 = vadd.f32 %v280_v55, %v266_v53  ;;  %v245_v57 = vadd.f32 %v244_v54, %v209_v23 }
 0x10b   :  { %v246_v60 = vadd.f32 %v364_v17, %v245_v57  ;;  %v282_v61 = vadd.f32 %v281_v56, %v267_v58  ;;  %v295_v17 = vlaneseq }
 0x10d   :  { %v283_v63 = vadd.f32 %v282_v61, %v268_v59  ;;  %v247_v0 = vadd.f32 %v365_v21, %v246_v60  ;;  %v296_v22 = vshrl.u32 %v295_v17, 7 }
 0x10f   :  { %v248_v2 = vadd.f32 %v247_v0, %v222_v36  ;;  %v284_v3 = vadd.f32 %v283_v63, %v269_v62  ;;  %vm298_vm0 = vcmp.eq.s32.totalorder %v296_v22, 1  ;;  %vm297_vm1 = vcmp.eq.s32.totalorder %v296_v22, 0 }
 0x111   :  { %v285_v4 = vadd.f32 %v284_v3, %v270_v1  ;;  %v249_v5 = vadd.f32 %v248_v2, %v225_v43 }
 0x113   :  { %v250_v8 = vadd.f32 %v368_v34, %v249_v5  ;;  %v286_v9 = vadd.f32 %v285_v4, %v271_v6 }
 0x115   :  { %v251_v11 = vadd.f32 %v369_v41, %v250_v8  ;;  %v287_v12 = vadd.f32 %v286_v9, %v272_v7 }
 0x117   :  { %v252_v13 = vrot.slane %v251_v11, 4  ;;  %v288_v14 = vadd.f32 %v287_v12, %v273_v10 }
 0x119   :  { %v253_v15 = vadd.f32 %v252_v13, %v251_v11  ;;  %v289_v16 = vrot.slane %v288_v14, 4 }
 0x11b   :  { %v254_v18 = vrot.slane %v253_v15, 2  ;;  %v290_v19 = vadd.f32 %v289_v16, %v288_v14 }
 0x11d   :  { %v255_v20 = vadd.f32 %v254_v18, %v253_v15  ;;  %v291_v21 = vrot.slane %v290_v19, 2 }
 0x11f   :  { %v292_v23 = vadd.f32 %v291_v21, %v290_v19  ;;  %v256_v24 = vrot.slane %v255_v20, 1 }
 0x121   :  { %v293_v25 = vrot.slane %v292_v23, 1  ;;  %v257_v27 = vadd.f32 %v256_v24, %v255_v20 }
 0x123   :  { %v294_v26 = vadd.f32 %v293_v25, %v292_v23 }
 0x125   :  { %v299_v28 = vsel %vm298_vm0, %v294_v26, 0.0 }
 0x126   :  { %v300_v29 = vsel %vm297_vm1, %v257_v27, %v299_v28 }
 0x127   :  { %301 = vst [vmem:[%s470_s2] sm:$0xff] %v300_v29 }

</bundles_post_ra>
